<compile_context>
chip_gen: v7x
topology: tpu7x:2x2x1
jax: 0.10.0
libtpu: 0.0.40
codegen_flags: <defaults>
</compile_context>

<pallas_src>
import functools

import jax
import jax.numpy as jnp
from jax.experimental import pallas as pl
from jax.experimental.pallas import tpu as pltpu


def _round_up(x, m):
    return (x + m - 1) // m * m


def _num_tensorcores():
    """Best-effort TensorCore count of device 0 (megacore parts => 2)."""
    try:
        dev = jax.devices()[0]
        for attr in ("num_cores", "core_count"):
            n = getattr(dev, attr, None)
            if isinstance(n, int) and n > 0:
                return n
    except Exception:
        pass
    return 1


_NUM_TENSORCORES = _num_tensorcores()

# Per-step VMEM budget used to size the batch tile.  Kept well under the
# default scoped VMEM limit (32 MiB on v6e/v7x), so no vmem_limit_bytes
# override is required on any generation.
_VMEM_BUDGET_BYTES = 16 * 1024 * 1024
_MAX_BLOCK_B = 1024


# ---------------------------------------------------------------------------
# Kernels
# ---------------------------------------------------------------------------

def _mlp_head_kernel(x_ref, w1_ref, b1_ref, w2_ref, b2_ref, w3_ref, b3_ref,
                     o_ref):
    """Fully fused MLP head on one batch tile.

      h1 = relu(x  @ w1 + b1)   (BN eval affine pre-folded into w1/b1)
      h2 = relu(h1 @ w2 + b2)   (BN eval affine pre-folded into w2/b2)
      y  = h2 @ w3 + b3         (output dim pre-padded to 128 lanes)

    Matmul operands are bf16 (MXU), accumulation and the bias/ReLU epilogue
    are f32, intermediates never leave on-chip memory.
    """
    x = x_ref[...]
    h1 = jnp.dot(x, w1_ref[...], preferred_element_type=jnp.float32)
    h1 = jnp.maximum(h1 + b1_ref[...], 0.0)                      # f32 epilogue
    h2 = jnp.dot(h1.astype(w2_ref.dtype), w2_ref[...],
                 preferred_element_type=jnp.float32)
    h2 = jnp.maximum(h2 + b2_ref[...], 0.0)
    y = jnp.dot(h2.astype(w3_ref.dtype), w3_ref[...],
                preferred_element_type=jnp.float32)
    o_ref[...] = (y + b3_ref[...]).astype(o_ref.dtype)


def _linear_kernel(x_ref, w_ref, b_ref, o_ref):
    """y = x @ W + b on one batch tile (output dim padded to 128 lanes)."""
    y = jnp.dot(x_ref[...], w_ref[...], preferred_element_type=jnp.float32)
    o_ref[...] = (y + b_ref[...]).astype(o_ref.dtype)


# ---------------------------------------------------------------------------
# Tiling helpers
# ---------------------------------------------------------------------------

def _row_align(dtype):
    # bf16 packs two rows per sublane; keep tiles on a 16-row grain there.
    return 16 if jnp.dtype(dtype).itemsize == 2 else 8


def _batch_tiling(batch, per_row_bytes, resident_bytes, row_align):
    """Pick (block_b, padded_b, n_tiles) from a VMEM budget + balanced split."""
    avail = max(_VMEM_BUDGET_BYTES - resident_bytes, row_align * per_row_bytes)
    cap = (avail // max(per_row_bytes, 1)) // row_align * row_align
    cap = max(row_align, min(_MAX_BLOCK_B, cap))
    n_tiles = pl.cdiv(batch, cap)
    # Megacore: keep >= 2 tiles so the "parallel" batch axis shards across
    # both TensorCores; on 1-TC chips just maximize the tile.
    if _NUM_TENSORCORES >= 2 and n_tiles == 1 and batch >= 2 * row_align:
        n_tiles = 2
    block_b = _round_up(pl.cdiv(batch, n_tiles), row_align)
    padded_b = block_b * n_tiles
    return block_b, padded_b, n_tiles


def _pad_rows(x, padded_b):
    if padded_b == x.shape[0]:
        return x
    return jnp.pad(x, ((0, padded_b - x.shape[0]), (0, 0)))


# ---------------------------------------------------------------------------
# Wrappers
# ---------------------------------------------------------------------------

def mlp_head(x, w1, b1, w2, b2, w3, b3, *, num_cls):
    """Fused 3-layer head. Weights already BN-folded (bf16); w3/b3 lane-padded."""
    B, Din = x.shape
    H1 = w1.shape[1]
    H2 = w2.shape[1]
    Np = w3.shape[1]                       # padded num_cls (multiple of 128)
    cdt = w1.dtype                         # MXU operand dtype (bf16)
    x = x.astype(cdt)

    w_it = jnp.dtype(cdt).itemsize
    # Per-row VMEM: double-buffered x/out tiles + f32 h1/h2 intermediates.
    per_row = 2 * w_it * Din + 2 * w_it * Np + 4 * (H1 + H2)
    # Resident (default double-buffered) weights + f32 biases.
    resident = 2 * (w_it * (w1.size + w2.size + w3.size)
                    + 4 * (b1.size + b2.size + b3.size))
    block_b, padded_b, nb = _batch_tiling(B, per_row, resident, _row_align(cdt))
    xp = _pad_rows(x, padded_b)

    def wspec(shape):                      # weights resident across batch grid
        return pl.BlockSpec(shape, lambda i: (0, 0))

    flops = 2 * padded_b * (Din * H1 + H1 * H2 + H2 * Np)
    bytes_accessed = (w_it * (xp.size + w1.size + w2.size + w3.size
                              + padded_b * Np)
                      + 4 * (b1.size + b2.size + b3.size))

    out = pl.pallas_call(
        _mlp_head_kernel,
        out_shape=jax.ShapeDtypeStruct((padded_b, Np), cdt),   # bf16 writeback
        grid=(nb,),
        in_specs=[
            pl.BlockSpec((block_b, Din), lambda i: (i, 0)),    # x tile
            wspec((Din, H1)), wspec((1, H1)),                  # layer 1
            wspec((H1, H2)), wspec((1, H2)),                   # layer 2
            wspec((H2, Np)), wspec((1, Np)),                   # layer 3
        ],
        out_specs=pl.BlockSpec((block_b, Np), lambda i: (i, 0)),
        compiler_params=pltpu.CompilerParams(
            dimension_semantics=("parallel",)),
        cost_estimate=pl.CostEstimate(
            flops=flops, transcendentals=0, bytes_accessed=bytes_accessed),
    )(xp, w1, b1, w2, b2, w3, b3)
    # Slice + upcast stay inside the same jit; kernel writeback remains bf16.
    return out[:B, :num_cls].astype(jnp.float32)


def linear_head(x, w, b, *, num_cls):
    """Single Linear head (mlp=False). w (bf16) / b (f32) already lane-padded."""
    B, Din = x.shape
    Np = w.shape[1]
    cdt = w.dtype
    x = x.astype(cdt)

    w_it = jnp.dtype(cdt).itemsize
    per_row = 2 * w_it * Din + 2 * w_it * Np
    resident = 2 * (w_it * w.size + 4 * b.size)
    block_b, padded_b, nb = _batch_tiling(B, per_row, resident, _row_align(cdt))
    xp = _pad_rows(x, padded_b)

    flops = 2 * padded_b * Din * Np
    bytes_accessed = w_it * (xp.size + w.size + padded_b * Np) + 4 * b.size

    out = pl.pallas_call(
        _linear_kernel,
        out_shape=jax.ShapeDtypeStruct((padded_b, Np), cdt),
        grid=(nb,),
        in_specs=[
            pl.BlockSpec((block_b, Din), lambda i: (i, 0)),
            pl.BlockSpec((Din, Np), lambda i: (0, 0)),
            pl.BlockSpec((1, Np), lambda i: (0, 0)),
        ],
        out_specs=pl.BlockSpec((block_b, Np), lambda i: (i, 0)),
        compiler_params=pltpu.CompilerParams(
            dimension_semantics=("parallel",)),
        cost_estimate=pl.CostEstimate(
            flops=flops, transcendentals=0, bytes_accessed=bytes_accessed),
    )(xp, w, b)
    return out[:B, :num_cls].astype(jnp.float32)


# ---------------------------------------------------------------------------
# Parameter construction (matches nn.Linear / nn.BatchNorm1d default init)
# ---------------------------------------------------------------------------

def init_linear(key, in_f, out_f, dtype=jnp.float32):
    """nn.Linear-shaped params; W stored pre-transposed as (in, out)."""
    kw, kb = jax.random.split(key)
    bound = 1.0 / jnp.sqrt(jnp.float32(in_f))
    w = jax.random.uniform(kw, (in_f, out_f), dtype, -bound, bound)
    b = jax.random.uniform(kb, (1, out_f), dtype, -bound, bound)
    return w, b


def fold_bn_eval(w, b, gamma=None, beta=None, running_mean=None,
                 running_var=None, eps=1e-5):
    """Fold inference-mode BatchNorm1d into the preceding Linear:
        scale = gamma / sqrt(var + eps)
        W' = W * scale,   b' = (b - mean) * scale + beta
    Defaults reproduce PyTorch init (gamma=1, beta=0, mean=0, var=1)."""
    out_f = w.shape[1]
    dt = w.dtype
    if gamma is None:
        gamma = jnp.ones((out_f,), dt)
    if beta is None:
        beta = jnp.zeros((out_f,), dt)
    if running_mean is None:
        running_mean = jnp.zeros((out_f,), dt)
    if running_var is None:
        running_var = jnp.ones((out_f,), dt)
    scale = gamma / jnp.sqrt(running_var + eps)
    shift = beta - running_mean * scale
    return w * scale[None, :], b * scale[None, :] + shift[None, :]


def pad_out_features(w, b, multiple=128):
    """Zero-pad the output feature dim so stores are lane-dense."""
    out_f = w.shape[1]
    padded = _round_up(out_f, multiple)
    if padded == out_f:
        return w, b
    pad = padded - out_f
    return jnp.pad(w, ((0, 0), (0, pad))), jnp.pad(b, ((0, 0), (0, pad)))


class ClassificationHeadPallas:
    def __init__(self, input_size, hidden_size, num_cls, mlp=False, key=None):
        if key is None:
            key = jax.random.PRNGKey(0)
        del hidden_size  # unused by the reference module's block as well
        self.mlp = mlp
        self.num_cls = num_cls
        if mlp:
            k1, k2, k3 = jax.random.split(key, 3)
            w1, b1 = init_linear(k1, input_size, 256)
            w2, b2 = init_linear(k2, 256, 128)
            w3, b3 = init_linear(k3, 128, num_cls)
            self._ref_params = (w1, b1, w2, b2, w3, b3)   # unfolded, for ref
            w1f, b1f = fold_bn_eval(w1, b1)
            w2f, b2f = fold_bn_eval(w2, b2)
            w3p, b3p = pad_out_features(w3, b3)
            # bf16 MXU operands, f32 biases (added in the f32 epilogue).
            self.params = (w1f.astype(jnp.bfloat16), b1f,
                           w2f.astype(jnp.bfloat16), b2f,
                           w3p.astype(jnp.bfloat16), b3p)
            self._forward = jax.jit(
                functools.partial(mlp_head, num_cls=num_cls))
        else:
            w, b = init_linear(key, input_size, num_cls)
            self._ref_params = (w, b)
            wp, bp = pad_out_features(w, b)
            self.params = (wp.astype(jnp.bfloat16), bp)
            self._forward = jax.jit(
                functools.partial(linear_head, num_cls=num_cls))

    def __call__(self, x):
        return self._forward(x, *self.params)

    # pure-JAX f32 reference (BatchNorm eval + identity Dropout) for checking
    def reference(self, x, eps=1e-5):
        if not self.mlp:
            w, b = self._ref_params
            return x @ w + b
        s = 1.0 / jnp.sqrt(1.0 + eps)
        w1, b1, w2, b2, w3, b3 = self._ref_params
        h = jnp.maximum((x @ w1 + b1) * s, 0.0)
        h = jnp.maximum((h @ w2 + b2) * s, 0.0)
        return h @ w3 + b3


if __name__ == "__main__":
    key = jax.random.PRNGKey(0)
    k_x, k_x2, k_p1, k_p2 = jax.random.split(key, 4)

    batch, input_size, hidden_size, num_cls = 8, 32, 64, 5
    x = jax.random.normal(k_x, (batch, input_size), jnp.float32)

    # mlp=False path (single Linear head, lane-padded bf16 writeback)
    head_lin = ClassificationHeadPallas(input_size, hidden_size, num_cls,
                                        mlp=False, key=k_p1)
    y_lin = jax.block_until_ready(head_lin(x))
    assert y_lin.shape == (batch, num_cls)
    assert jnp.allclose(y_lin, head_lin.reference(x), atol=5e-2, rtol=5e-2)

    # mlp=True path (fully fused Linear+BN+ReLU x2 + Linear in one kernel)
    head_mlp = ClassificationHeadPallas(input_size, hidden_size, num_cls,
                                        mlp=True, key=k_p2)
    y_mlp = jax.block_until_ready(head_mlp(x))
    assert y_mlp.shape == (batch, num_cls)
    assert jnp.allclose(y_mlp, head_mlp.reference(x), atol=5e-2, rtol=5e-2)

    # exercise the ragged / multi-tile batch path (balanced tiling + pad rows)
    batch2 = 40
    x2 = jax.random.normal(k_x2, (batch2, input_size), jnp.float32)
    y_mlp2 = jax.block_until_ready(head_mlp(x2))
    assert y_mlp2.shape == (batch2, num_cls)
    assert jnp.allclose(y_mlp2, head_mlp.reference(x2), atol=5e-2, rtol=5e-2)

    print("KERNEL_OK")
</pallas_src>

<mosaic_0001>
module attributes {stable_mosaic.version = 11 : i64} {
  func.func @_linear_kernel(%arg0: i32, %arg1: memref<16x32xbf16, #tpu.memory_space<vmem>>, %arg2: memref<32x128xbf16, #tpu.memory_space<vmem>>, %arg3: memref<1x128xf32, #tpu.memory_space<vmem>>, %arg4: memref<16x128xbf16, #tpu.memory_space<vmem>>) attributes {dimension_semantics = [#tpu.dimension_semantics<parallel>], iteration_bounds = array<i64: 1>, scalar_prefetch = 0 : i64, scratch_operands = 0 : i64, tpu.core_type = #tpu.core_type<tc>, window_params = [{transform_indices = @transform_0, window_bounds = array<i64: 16, 32>}, {pipeline_mode = #tpu.pipeline_mode<synchronous>, transform_indices = @transform_1, window_bounds = array<i64: 32, 128>}, {pipeline_mode = #tpu.pipeline_mode<synchronous>, transform_indices = @transform_2, window_bounds = array<i64: 1, 128>}, {transform_indices = @transform_3, window_bounds = array<i64: 16, 128>}]} {
    %c0 = arith.constant 0 : index
    %c0_0 = arith.constant 0 : index
    %0 = vector.load %arg1[%c0, %c0_0] : memref<16x32xbf16, #tpu.memory_space<vmem>>, vector<16x32xbf16>
    %c0_1 = arith.constant 0 : index
    %c0_2 = arith.constant 0 : index
    %1 = vector.load %arg2[%c0_1, %c0_2] : memref<32x128xbf16, #tpu.memory_space<vmem>>, vector<32x128xbf16>
    %cst = arith.constant dense<0.000000e+00> : vector<16x128xf32>
    %2 = tpu.matmul %0, %1, %cst {dimension_numbers = #tpu.dot_dimension_numbers<[1], [0], [0], [1], [0, 0, 1, 1], [], []>} : vector<16x32xbf16>, vector<32x128xbf16>, vector<16x128xf32> -> vector<16x128xf32>
    %c0_3 = arith.constant 0 : index
    %c0_4 = arith.constant 0 : index
    %3 = vector.load %arg3[%c0_3, %c0_4] : memref<1x128xf32, #tpu.memory_space<vmem>>, vector<1x128xf32>
    %4 = vector.broadcast %3 : vector<1x128xf32> to vector<16x128xf32>
    %5 = arith.addf %2, %4 : vector<16x128xf32>
    %6 = arith.truncf %5 : vector<16x128xf32> to vector<16x128xbf16>
    %c0_5 = arith.constant 0 : index
    %c0_6 = arith.constant 0 : index
    %7 = vector.load %arg4[%c0_5, %c0_6] : memref<16x128xbf16, #tpu.memory_space<vmem>>, vector<16x128xbf16>
    tpu.vector_store %arg4[%c0_5, %c0_6], %6 {strides = array<i32>} : memref<16x128xbf16, #tpu.memory_space<vmem>>, vector<16x128xbf16>,
    return
  }
  func.func @transform_0(%arg0: i32) -> (i32, i32) {
    %c0_i32 = arith.constant 0 : i32
    %c0_i32_0 = arith.constant 0 : i32
    return %arg0, %c0_i32 : i32, i32
  }
  func.func @transform_1(%arg0: i32) -> (i32, i32) {
    %c0_i32 = arith.constant 0 : i32
    %c0_i32_0 = arith.constant 0 : i32
    %c0_i32_1 = arith.constant 0 : i32
    return %c0_i32, %c0_i32_0 : i32, i32
  }
  func.func @transform_2(%arg0: i32) -> (i32, i32) {
    %c0_i32 = arith.constant 0 : i32
    %c0_i32_0 = arith.constant 0 : i32
    %c0_i32_1 = arith.constant 0 : i32
    return %c0_i32, %c0_i32_0 : i32, i32
  }
  func.func @transform_3(%arg0: i32) -> (i32, i32) {
    %c0_i32 = arith.constant 0 : i32
    %c0_i32_0 = arith.constant 0 : i32
    return %arg0, %c0_i32 : i32, i32
  }
}

</mosaic_0001>

<bundles_post_ra>
// kernel: linear_head.1
= control target key start
LH: loop header
LB: loop body
LE: loop exit
PB: predicated region body
PF: predicated region fallthrough
CT: control target
= control target key end

     0   :  { %v134_v0 = vmov 0.0   ;;  %vm135_vm0 = vmmov 0   ;;  %vm45_vm1 = vcmask 261120   ;;  %s171_s1 = inlined_call_operand.vmem [shape: bf16[32,128], index: 1, kind: input, shape index: {}]   ;;  %s172_s0 = inlined_call_operand.vmem [shape: bf16[16,32], index: 0, kind: input, shape index: {}]   ;;  %s173_s2 = inlined_call_operand.vmem [shape: f32[1,128], index: 2, kind: input, shape index: {}]   ;;  %s174_s3 = inlined_call_operand.vmem [shape: bf16[16,128], index: 3, kind: output, shape index: {}]  }
   0x1   :  { %121 = vmatprep.subr.bf16.mxu0 %v134_v0  ;;  %v131_v1 = vld [vmem:[%s171_s1] sm:$0xff]   ;;  %125 = vmatprep.mubr.msk.bf16.mxu0 %vm135_vm0, %v134_v0  ;;  %v132_v2 = vld [vmem:[%s171_s1 + $0x8] sm:$0xff]  }
   0x2   :  { %122 = vmatpush3.bf16.msra.mxu0 %v131_v1  ;;  %v133_v3 = vld [vmem:[%s172_s0] sm:$0xff]  }
   0x3   :  { %123 = vmatprep.subr.bf16.mxu0 %v134_v0  ;;  %v104_v4 = vld [vmem:[%s173_s2] ss:$0 sm:$0xff] }
   0x6   :  { %124 = vmatpush3.bf16.msra.mxu0 %v132_v2 }
   0x9   :  { %126 = vmatmul.mubr.msk.bf16.vlgmr.msra.gmra.mrb[0].mxu0 %vm45_vm1, %v133_v3 }
  0xdc   :  { %v83_v5 = vpop.f32.mrb[0].mxu0 }
  0xdd   :  { %v127_v6 = vpop.f32.mrb[1].mxu0  ;;  %v84_v8 = vadd.f32 %v104_v4, %v83_v5 }
  0xde   :  { %v86_v7 = vpop.f32.mrb[2].mxu0 }
  0xdf   :  { %v87_v9 = vadd.f32 %v104_v4, %v86_v7  ;;  %v128_v10 = vpop.f32.mrb[3].mxu0 }
  0xe1   :  { %v116_v11 = vpack.c.bf16 %v87_v9, %v84_v8 }
  0xe3   :  { %117 = vst [vmem:[%s174_s3] sm:$0xff] %v116_v11  }

</bundles_post_ra>
